<compile_context>
chip_gen: v6e
topology: v6e:2x2x1
jax: 0.10.0
libtpu: 0.0.40
codegen_flags: <defaults>
</compile_context>

<pallas_src>
import functools
from typing import NamedTuple

import jax
import jax.numpy as jnp
from jax.experimental import pallas as pl
from jax.experimental.pallas import tpu as pltpu

_LANE = 128     # lane width (last dim alignment)
_SUBLANE = 16   # bf16 sublane packing (second-to-last dim alignment)


def _round_up(n, m):
    return ((n + m - 1) // m) * m


def _cdiv(a, b):
    return -(-a // b)


def _pad2d(a, rows, cols):
    r, c = a.shape
    return jnp.pad(a, ((0, rows - r), (0, cols - c)))


# --------------------------------------------------------------------------
# One-time feature / hardware detection (never wraps the real kernel).
# --------------------------------------------------------------------------

@functools.lru_cache(maxsize=None)
def _vmem_capacity_bytes():
    """Per-TensorCore VMEM capacity; conservative 64 MiB (v7x) fallback."""
    try:
        return int(pltpu.get_tpu_info().vmem_capacity_bytes)
    except Exception:
        return 64 * 1024 * 1024


@functools.lru_cache(maxsize=None)
def _single_buffered_blocks_supported():
    """Probe once whether grid-invariant blocks can be single-buffered via
    BlockSpec(pipeline_mode=pl.Buffered(1))."""
    if not hasattr(pl, "Buffered"):
        return False

    def _probe(a_ref, o_ref):
        o_ref[...] = a_ref[...] * 2.0

    try:
        fn = pl.pallas_call(
            _probe,
            out_shape=jax.ShapeDtypeStruct((32, 128), jnp.float32),
            grid=(2,),
            in_specs=[pl.BlockSpec((16, 128), lambda i: (0, 0),
                                   pipeline_mode=pl.Buffered(1))],
            out_specs=pl.BlockSpec((16, 128), lambda i: (i, 0)),
        )
        jax.block_until_ready(fn(jnp.ones((16, 128), jnp.float32)))
        return True
    except Exception:
        # Feature probe only -- the production kernel never hides failures.
        return False


# --------------------------------------------------------------------------
# Parameter preparation (run ONCE, not per forward call).
# --------------------------------------------------------------------------

class MLPParams(NamedTuple):
    w1: jax.Array   # [in_p,  hid_p] bf16
    b1: jax.Array   # [1,     hid_p] f32
    w2: jax.Array   # [hid_p, hid_p] bf16
    b2: jax.Array   # [1,     hid_p] f32
    w3: jax.Array   # [hid_p, out_p] bf16
    b3: jax.Array   # [1,     out_p] f32
    in_dim: int
    hidden: int
    out_dim: int


def prepare_mlp_params(w1, b1, w2, b2, w3, b3):
    """Pad feature dims to 128 lanes and cast weights to bf16, once.

    Weights are stored [in_features, out_features] (transpose of PyTorch
    nn.Linear). Doing this at init time removes the per-call XLA pad+convert
    that would otherwise multiply weight HBM traffic.
    """
    in_dim, hidden = w1.shape
    out_dim = w3.shape[1]
    in_p = _round_up(in_dim, _LANE)
    hid_p = _round_up(hidden, _LANE)
    out_p = _round_up(out_dim, _LANE)
    return MLPParams(
        w1=_pad2d(w1, in_p, hid_p).astype(jnp.bfloat16),
        b1=_pad2d(b1.reshape(1, -1), 1, hid_p).astype(jnp.float32),
        w2=_pad2d(w2, hid_p, hid_p).astype(jnp.bfloat16),
        b2=_pad2d(b2.reshape(1, -1), 1, hid_p).astype(jnp.float32),
        w3=_pad2d(w3, hid_p, out_p).astype(jnp.bfloat16),
        b3=_pad2d(b3.reshape(1, -1), 1, out_p).astype(jnp.float32),
        in_dim=int(in_dim), hidden=int(hidden), out_dim=int(out_dim),
    )


# --------------------------------------------------------------------------
# Kernel
# --------------------------------------------------------------------------

def mlp_kernel(x_ref, w1_ref, b1_ref, w2_ref, b2_ref, w3_ref, b3_ref, o_ref,
               h1_ref, h2_ref):
    # Layer 1: relu(x @ W1 + b1)   (bf16 operands, f32 accumulation)
    h1 = jnp.dot(x_ref[...], w1_ref[...], preferred_element_type=jnp.float32)
    h1_ref[...] = jnp.maximum(h1 + b1_ref[...], 0.0).astype(h1_ref.dtype)
    # Layer 2: relu(h1 @ W2 + b2)
    h2 = jnp.dot(h1_ref[...], w2_ref[...], preferred_element_type=jnp.float32)
    h2_ref[...] = jnp.maximum(h2 + b2_ref[...], 0.0).astype(h2_ref.dtype)
    # Layer 3: h2 @ W3 + b3  (no activation)
    o = jnp.dot(h2_ref[...], w3_ref[...], preferred_element_type=jnp.float32)
    o_ref[...] = (o + b3_ref[...]).astype(o_ref.dtype)


# --------------------------------------------------------------------------
# Forward wrapper
# --------------------------------------------------------------------------

def mlp_forward(x, params: MLPParams, *, out_dtype=jnp.float32,
                block_batch=None):
    """fc1 -> relu -> fc2 -> relu -> fc3 on pre-prepared (padded/bf16) params.

    x: [B, in_features] (any dtype castable to bf16). Arbitrary B is handled
    by padding the batch to an aligned tile; padded rows are sliced off.
    """
    B, in_dim = x.shape
    assert in_dim == params.in_dim, (in_dim, params.in_dim)
    in_p = params.w1.shape[0]
    hid_p = params.w1.shape[1]
    out_p = params.w3.shape[1]
    out_dim = params.out_dim
    out_itemsize = jnp.dtype(out_dtype).itemsize

    single_buffered = _single_buffered_blocks_supported()
    capacity = _vmem_capacity_bytes()

    # Resident weight/bias VMEM (single- or double-buffered).
    wf = 1 if single_buffered else 2
    weight_bytes = wf * (2 * (in_p * hid_p + hid_p * hid_p + hid_p * out_p)
                         + 4 * (2 * hid_p + out_p))
    # Per-batch-row VMEM: x tile (x2 buffers, bf16), out tile (x2 buffers),
    # h1/h2 scratch (bf16).
    per_row_bytes = (2 * in_p * 2) + (2 * out_p * out_itemsize) + (2 * hid_p * 2)

    # ---- choose block_batch ----
    B16 = _round_up(max(B, 1), _SUBLANE)
    if block_batch is None:
        cap = 1024  # amortizes ~0.35us/grid-step overhead
        usable_for_tiles = int(capacity * 0.6) - weight_bytes
        rows_budget = usable_for_tiles // max(per_row_bytes, 1)
        if rows_budget < _SUBLANE:
            # TODO(synk): resident weights (nearly) exceed the per-core VMEM
            # budget (v7x, hidden >~3K): stream W2/W3 in hidden-dim chunks via
            # pltpu.emit_pipeline instead of keeping all weights resident.
            rows_budget = _SUBLANE
        rows_budget = max(_SUBLANE, (rows_budget // _SUBLANE) * _SUBLANE)
        cap = min(cap, rows_budget)
        # Megacore-aware: ensure grid >= 2 whenever B > 16 so the "parallel"
        # axis can split across the two v7x TensorCores.
        if B16 > _SUBLANE:
            cap = min(cap, max(_SUBLANE, _round_up(_cdiv(B16, 2), _SUBLANE)))
        # Minimize batch padding: smallest tile that still needs the same
        # number of grid steps.
        n_tiles = _cdiv(B16, cap)
        block_batch = _round_up(_cdiv(B16, n_tiles), _SUBLANE)
    else:
        block_batch = _round_up(int(block_batch), _SUBLANE)
        n_tiles = _cdiv(B16, block_batch)

    B_p = n_tiles * block_batch
    grid = (n_tiles,)

    # Only x needs per-call padding/casting (weights were prepared once).
    xp = _pad2d(x.astype(jnp.bfloat16), B_p, in_p)

    # ---- VMEM limit: derived from the actual footprint, generation-aware ----
    footprint = (weight_bytes
                 + 2 * block_batch * in_p * 2
                 + 2 * block_batch * out_p * out_itemsize
                 + 2 * block_batch * hid_p * 2)
    needed = int(footprint * 1.3) + (2 << 20)   # headroom for internal scratch
    vmem_limit = min(capacity * 3 // 4, max(needed, 32 * 1024 * 1024))

    flops = 2 * B_p * (in_p * hid_p + hid_p * hid_p + hid_p * out_p)
    bytes_accessed = (xp.size * 2
                      + (params.w1.size + params.w2.size + params.w3.size) * 2
                      + (params.b1.size + params.b2.size + params.b3.size) * 4
                      + B_p * out_p * out_itemsize)
    cost = pl.CostEstimate(flops=flops, transcendentals=0,
                           bytes_accessed=bytes_accessed)

    def const_spec(shape):
        # Grid-invariant block; single-buffered when supported.
        if single_buffered:
            return pl.BlockSpec(shape, lambda i: (0, 0),
                                pipeline_mode=pl.Buffered(1))
        return pl.BlockSpec(shape, lambda i: (0, 0))

    out_padded = pl.pallas_call(
        mlp_kernel,
        out_shape=jax.ShapeDtypeStruct((B_p, out_p), out_dtype),
        grid_spec=pltpu.PrefetchScalarGridSpec(
            num_scalar_prefetch=0,
            grid=grid,
            in_specs=[
                pl.BlockSpec((block_batch, in_p), lambda i: (i, 0)),  # x tile
                const_spec((in_p, hid_p)),    # W1
                const_spec((1, hid_p)),       # b1
                const_spec((hid_p, hid_p)),   # W2
                const_spec((1, hid_p)),       # b2
                const_spec((hid_p, out_p)),   # W3
                const_spec((1, out_p)),       # b3
            ],
            out_specs=pl.BlockSpec((block_batch, out_p), lambda i: (i, 0)),
            scratch_shapes=[
                pltpu.VMEM((block_batch, hid_p), jnp.bfloat16),  # h1
                pltpu.VMEM((block_batch, hid_p), jnp.bfloat16),  # h2
            ],
        ),
        compiler_params=pltpu.CompilerParams(
            dimension_semantics=("parallel",),
            vmem_limit_bytes=int(vmem_limit),
        ),
        cost_estimate=cost,
    )(xp, params.w1, params.b1, params.w2, params.b2, params.w3, params.b3)

    # TODO(synk): optional int8 (v5e/v6e) / fp8 (v7x) weight path for the
    # weight-bandwidth-bound small-batch regime, gated behind a flag.
    return out_padded[:B, :out_dim]


# --------------------------------------------------------------------------
# Init + self-test
# --------------------------------------------------------------------------

def init_linear(key, in_features, out_features):
    # Mimic PyTorch nn.Linear default init: U(-1/sqrt(in), 1/sqrt(in)).
    kw, kb = jax.random.split(key)
    bound = 1.0 / jnp.sqrt(jnp.float32(in_features))
    # Stored as [in, out] (transpose of PyTorch's [out, in]).
    w = jax.random.uniform(kw, (in_features, out_features), jnp.float32,
                           minval=-bound, maxval=bound)
    b = jax.random.uniform(kb, (out_features,), jnp.float32,
                           minval=-bound, maxval=bound)
    return w, b


if __name__ == "__main__":
    key = jax.random.PRNGKey(0)
    k_x, k1, k2, k3 = jax.random.split(key, 4)

    batch = 8
    input_size = 16
    hidden_size = 32
    output_size = 8

    x = jax.random.normal(k_x, (batch, input_size), jnp.float32)
    w1, b1 = init_linear(k1, input_size, hidden_size)
    w2, b2 = init_linear(k2, hidden_size, hidden_size)
    w3, b3 = init_linear(k3, hidden_size, output_size)

    # One-time weight preparation (pad + bf16 cast hoisted out of the call).
    params = prepare_mlp_params(w1, b1, w2, b2, w3, b3)

    out = mlp_forward(x, params)
    out = jax.block_until_ready(out)
    assert out.shape == (batch, output_size)

    # Pure-JAX reference mirroring the kernel's bf16-operand / f32-accumulate
    # policy (the original PyTorch module is f32; bf16 is a perf choice).
    bf = jnp.bfloat16
    h = jnp.maximum(jnp.dot(x.astype(bf), w1.astype(bf),
                            preferred_element_type=jnp.float32) + b1, 0.0)
    h = jnp.maximum(jnp.dot(h.astype(bf), w2.astype(bf),
                            preferred_element_type=jnp.float32) + b2, 0.0)
    ref = jnp.dot(h.astype(bf), w3.astype(bf),
                  preferred_element_type=jnp.float32) + b3

    assert jnp.allclose(out, ref, atol=2e-2, rtol=2e-2), (
        float(jnp.max(jnp.abs(out - ref))))

    print("KERNEL_OK")
</pallas_src>

<mosaic_0001>
module attributes {stable_mosaic.version = 11 : i64} {
  func.func @_probe(%arg0: i32, %arg1: memref<16x128xf32, #tpu.memory_space<vmem>>, %arg2: memref<16x128xf32, #tpu.memory_space<vmem>>) attributes {dimension_semantics = [#tpu.dimension_semantics<arbitrary>], iteration_bounds = array<i64: 2>, scalar_prefetch = 0 : i64, scratch_operands = 0 : i64, tpu.core_type = #tpu.core_type<tc>, window_params = [{pipeline_mode = #tpu.pipeline_mode<synchronous>, transform_indices = @transform_0, window_bounds = array<i64: 16, 128>}, {transform_indices = @transform_1, window_bounds = array<i64: 16, 128>}]} {
    %c0 = arith.constant 0 : index
    %c0_0 = arith.constant 0 : index
    %0 = vector.load %arg1[%c0, %c0_0] : memref<16x128xf32, #tpu.memory_space<vmem>>, vector<16x128xf32>
    %cst = arith.constant 2.000000e+00 : f32
    %1 = vector.broadcast %cst : f32 to vector<16x128xf32>
    %2 = arith.mulf %0, %1 : vector<16x128xf32>
    %c0_1 = arith.constant 0 : index
    %c0_2 = arith.constant 0 : index
    %3 = vector.load %arg2[%c0_1, %c0_2] : memref<16x128xf32, #tpu.memory_space<vmem>>, vector<16x128xf32>
    tpu.vector_store %arg2[%c0_1, %c0_2], %2 {strides = array<i32>} : memref<16x128xf32, #tpu.memory_space<vmem>>, vector<16x128xf32>,
    return
  }
  func.func @transform_0(%arg0: i32) -> (i32, i32) {
    %c0_i32 = arith.constant 0 : i32
    %c0_i32_0 = arith.constant 0 : i32
    %c0_i32_1 = arith.constant 0 : i32
    return %c0_i32, %c0_i32_0 : i32, i32
  }
  func.func @transform_1(%arg0: i32) -> (i32, i32) {
    %c0_i32 = arith.constant 0 : i32
    %c0_i32_0 = arith.constant 0 : i32
    return %arg0, %c0_i32 : i32, i32
  }
}

module attributes {stable_mosaic.version = 11 : i64} {
  func.func @mlp_kernel(%arg0: i32, %arg1: memref<16x128xbf16, #tpu.memory_space<vmem>>, %arg2: memref<128x128xbf16, #tpu.memory_space<vmem>>, %arg3: memref<1x128xf32, #tpu.memory_space<vmem>>, %arg4: memref<128x128xbf16, #tpu.memory_space<vmem>>, %arg5: memref<1x128xf32, #tpu.memory_space<vmem>>, %arg6: memref<128x128xbf16, #tpu.memory_space<vmem>>, %arg7: memref<1x128xf32, #tpu.memory_space<vmem>>, %arg8: memref<16x128xf32, #tpu.memory_space<vmem>>, %arg9: memref<16x128xbf16, #tpu.memory_space<vmem>>, %arg10: memref<16x128xbf16, #tpu.memory_space<vmem>>) attributes {dimension_semantics = [#tpu.dimension_semantics<parallel>], iteration_bounds = array<i64: 1>, scalar_prefetch = 0 : i64, scratch_operands = 2 : i64, tpu.core_type = #tpu.core_type<tc>, window_params = [{transform_indices = @transform_0, window_bounds = array<i64: 16, 128>}, {pipeline_mode = #tpu.pipeline_mode<synchronous>, transform_indices = @transform_1, window_bounds = array<i64: 128, 128>}, {pipeline_mode = #tpu.pipeline_mode<synchronous>, transform_indices = @transform_2, window_bounds = array<i64: 1, 128>}, {pipeline_mode = #tpu.pipeline_mode<synchronous>, transform_indices = @transform_3, window_bounds = array<i64: 128, 128>}, {pipeline_mode = #tpu.pipeline_mode<synchronous>, transform_indices = @transform_4, window_bounds = array<i64: 1, 128>}, {pipeline_mode = #tpu.pipeline_mode<synchronous>, transform_indices = @transform_5, window_bounds = array<i64: 128, 128>}, {pipeline_mode = #tpu.pipeline_mode<synchronous>, transform_indices = @transform_6, window_bounds = array<i64: 1, 128>}, {transform_indices = @transform_7, window_bounds = array<i64: 16, 128>}]} {
    %c0 = arith.constant 0 : index
    %c0_0 = arith.constant 0 : index
    %0 = vector.load %arg1[%c0, %c0_0] : memref<16x128xbf16, #tpu.memory_space<vmem>>, vector<16x128xbf16>
    %c0_1 = arith.constant 0 : index
    %c0_2 = arith.constant 0 : index
    %1 = vector.load %arg2[%c0_1, %c0_2] : memref<128x128xbf16, #tpu.memory_space<vmem>>, vector<128x128xbf16>
    %cst = arith.constant dense<0.000000e+00> : vector<16x128xf32>
    %2 = tpu.matmul %0, %1, %cst {dimension_numbers = #tpu.dot_dimension_numbers<[1], [0], [0], [1], [0, 0, 1, 1], [], []>} : vector<16x128xbf16>, vector<128x128xbf16>, vector<16x128xf32> -> vector<16x128xf32>
    %c0_3 = arith.constant 0 : index
    %c0_4 = arith.constant 0 : index
    %3 = vector.load %arg3[%c0_3, %c0_4] : memref<1x128xf32, #tpu.memory_space<vmem>>, vector<1x128xf32>
    %4 = vector.broadcast %3 : vector<1x128xf32> to vector<16x128xf32>
    %5 = arith.addf %2, %4 : vector<16x128xf32>
    %cst_5 = arith.constant 0.000000e+00 : f32
    %6 = vector.broadcast %cst_5 : f32 to vector<16x128xf32>
    %7 = arith.maximumf %5, %6 : vector<16x128xf32>
    %8 = arith.truncf %7 : vector<16x128xf32> to vector<16x128xbf16>
    %c0_6 = arith.constant 0 : index
    %c0_7 = arith.constant 0 : index
    %9 = vector.load %arg9[%c0_6, %c0_7] : memref<16x128xbf16, #tpu.memory_space<vmem>>, vector<16x128xbf16>
    tpu.vector_store %arg9[%c0_6, %c0_7], %8 {strides = array<i32>} : memref<16x128xbf16, #tpu.memory_space<vmem>>, vector<16x128xbf16>,
    %c0_8 = arith.constant 0 : index
    %c0_9 = arith.constant 0 : index
    %10 = vector.load %arg9[%c0_8, %c0_9] : memref<16x128xbf16, #tpu.memory_space<vmem>>, vector<16x128xbf16>
    %c0_10 = arith.constant 0 : index
    %c0_11 = arith.constant 0 : index
    %11 = vector.load %arg4[%c0_10, %c0_11] : memref<128x128xbf16, #tpu.memory_space<vmem>>, vector<128x128xbf16>
    %cst_12 = arith.constant dense<0.000000e+00> : vector<16x128xf32>
    %12 = tpu.matmul %10, %11, %cst_12 {dimension_numbers = #tpu.dot_dimension_numbers<[1], [0], [0], [1], [0, 0, 1, 1], [], []>} : vector<16x128xbf16>, vector<128x128xbf16>, vector<16x128xf32> -> vector<16x128xf32>
    %c0_13 = arith.constant 0 : index
    %c0_14 = arith.constant 0 : index
    %13 = vector.load %arg5[%c0_13, %c0_14] : memref<1x128xf32, #tpu.memory_space<vmem>>, vector<1x128xf32>
    %14 = vector.broadcast %13 : vector<1x128xf32> to vector<16x128xf32>
    %15 = arith.addf %12, %14 : vector<16x128xf32>
    %cst_15 = arith.constant 0.000000e+00 : f32
    %16 = vector.broadcast %cst_15 : f32 to vector<16x128xf32>
    %17 = arith.maximumf %15, %16 : vector<16x128xf32>
    %18 = arith.truncf %17 : vector<16x128xf32> to vector<16x128xbf16>
    %c0_16 = arith.constant 0 : index
    %c0_17 = arith.constant 0 : index
    %19 = vector.load %arg10[%c0_16, %c0_17] : memref<16x128xbf16, #tpu.memory_space<vmem>>, vector<16x128xbf16>
    tpu.vector_store %arg10[%c0_16, %c0_17], %18 {strides = array<i32>} : memref<16x128xbf16, #tpu.memory_space<vmem>>, vector<16x128xbf16>,
    %c0_18 = arith.constant 0 : index
    %c0_19 = arith.constant 0 : index
    %20 = vector.load %arg10[%c0_18, %c0_19] : memref<16x128xbf16, #tpu.memory_space<vmem>>, vector<16x128xbf16>
    %c0_20 = arith.constant 0 : index
    %c0_21 = arith.constant 0 : index
    %21 = vector.load %arg6[%c0_20, %c0_21] : memref<128x128xbf16, #tpu.memory_space<vmem>>, vector<128x128xbf16>
    %cst_22 = arith.constant dense<0.000000e+00> : vector<16x128xf32>
    %22 = tpu.matmul %20, %21, %cst_22 {dimension_numbers = #tpu.dot_dimension_numbers<[1], [0], [0], [1], [0, 0, 1, 1], [], []>} : vector<16x128xbf16>, vector<128x128xbf16>, vector<16x128xf32> -> vector<16x128xf32>
    %c0_23 = arith.constant 0 : index
    %c0_24 = arith.constant 0 : index
    %23 = vector.load %arg7[%c0_23, %c0_24] : memref<1x128xf32, #tpu.memory_space<vmem>>, vector<1x128xf32>
    %24 = vector.broadcast %23 : vector<1x128xf32> to vector<16x128xf32>
    %25 = arith.addf %22, %24 : vector<16x128xf32>
    %c0_25 = arith.constant 0 : index
    %c0_26 = arith.constant 0 : index
    %26 = vector.load %arg8[%c0_25, %c0_26] : memref<16x128xf32, #tpu.memory_space<vmem>>, vector<16x128xf32>
    tpu.vector_store %arg8[%c0_25, %c0_26], %25 {strides = array<i32>} : memref<16x128xf32, #tpu.memory_space<vmem>>, vector<16x128xf32>,
    return
  }
  func.func @transform_0(%arg0: i32) -> (i32, i32) {
    %c0_i32 = arith.constant 0 : i32
    %c0_i32_0 = arith.constant 0 : i32
    return %arg0, %c0_i32 : i32, i32
  }
  func.func @transform_1(%arg0: i32) -> (i32, i32) {
    %c0_i32 = arith.constant 0 : i32
    %c0_i32_0 = arith.constant 0 : i32
    %c0_i32_1 = arith.constant 0 : i32
    return %c0_i32, %c0_i32_0 : i32, i32
  }
  func.func @transform_2(%arg0: i32) -> (i32, i32) {
    %c0_i32 = arith.constant 0 : i32
    %c0_i32_0 = arith.constant 0 : i32
    %c0_i32_1 = arith.constant 0 : i32
    return %c0_i32, %c0_i32_0 : i32, i32
  }
  func.func @transform_3(%arg0: i32) -> (i32, i32) {
    %c0_i32 = arith.constant 0 : i32
    %c0_i32_0 = arith.constant 0 : i32
    %c0_i32_1 = arith.constant 0 : i32
    return %c0_i32, %c0_i32_0 : i32, i32
  }
  func.func @transform_4(%arg0: i32) -> (i32, i32) {
    %c0_i32 = arith.constant 0 : i32
    %c0_i32_0 = arith.constant 0 : i32
    %c0_i32_1 = arith.constant 0 : i32
    return %c0_i32, %c0_i32_0 : i32, i32
  }
  func.func @transform_5(%arg0: i32) -> (i32, i32) {
    %c0_i32 = arith.constant 0 : i32
    %c0_i32_0 = arith.constant 0 : i32
    %c0_i32_1 = arith.constant 0 : i32
    return %c0_i32, %c0_i32_0 : i32, i32
  }
  func.func @transform_6(%arg0: i32) -> (i32, i32) {
    %c0_i32 = arith.constant 0 : i32
    %c0_i32_0 = arith.constant 0 : i32
    %c0_i32_1 = arith.constant 0 : i32
    return %c0_i32, %c0_i32_0 : i32, i32
  }
  func.func @transform_7(%arg0: i32) -> (i32, i32) {
    %c0_i32 = arith.constant 0 : i32
    %c0_i32_0 = arith.constant 0 : i32
    return %arg0, %c0_i32 : i32, i32
  }
}

</mosaic_0001>

<bundles_post_ra>
// kernel: tpu_custom_call.1
= control target key start
LH: loop header
LB: loop body
LE: loop exit
PB: predicated region body
PF: predicated region fallthrough
CT: control target
= control target key end

     0   :  { %6 = vsyncpa [#allocation3], 0  ;;  %s482_s0 = inlined_call_operand.hbm [shape: f32[16,128], index: 0, kind: input, shape index: {}]   ;;  %s483_s1 = inlined_call_operand.hbm [shape: f32[32,128], index: 1, kind: output, shape index: {}]  }
   0x1   :  { %7 = vsyncpa [#allocation4], 0 }
   0x2   :  { %9 = vsyncpa [#allocation4 + $0x1], 0  ;;  %s367_s6 = smov 0   ;;  %s369_s7 = smov 0  }
   0x3   :  { %s371_s8 = smov 0   ;;  %s373_s9 = smov 0  }
   0x4 LB: > { %s388_s10 = sadd.s32 4294967295, %s349_s9   ;;  %s193_s11 = sadd.s32 4294967294, %s349_s9   ;;  %s349_s9 = sphi %s373_s9, %s491_s9   ;;  %s345_s8 = sphi %s371_s8, %s490_s8   ;;  %s341_s7 = sphi %s369_s7, %s489_s7   ;;  %s337_s6 = sphi %s367_s6, %s488_s6  }
   0x5   : > { %s392_s12 = sadd.s32 1, %s349_s9   ;;  %s43_s13 = sadd.s32 1, %s345_s8 }
   0x6   : > { %s40_s14 = ssub.s32 %s349_s9, %s392_s12  ;;  %p53_p0 = scmp.ne.s32.totalorder %s345_s8, %s341_s7 }
   0x7   : > { %p41_p1 = scmp.eq.s32.totalorder %s40_s14, 0  ;;  %p54_p2 = scmp.eq.s32.totalorder %s388_s10, 1 }
   0x8   : > { %p59_p3 = scmp.ne.s32.totalorder %s341_s7, %s337_s6  ;;  %p60_p4 = scmp.eq.s32.totalorder %s193_s11, 1 }
   0x9   : > { %s403_s15 = scalar_select %p41_p1, %s345_s8, %s43_s13  }
   0xa   : > { %p405_p5 = por %p54_p2, %p53_p0  ;;  %p409_p6 = por %p60_p4, %p59_p3 }
   0xb   : > { %p194_p7 = scmp.ge.s32.totalorder %s349_s9, 1  ;;  %p67_p8 = scmp.lt.s32.totalorder %s349_s9, 3 }
   0xc   : > { %s485_s17 = scalar_select %p409_p6, 1, 0 }
   0xd   : > { %p219_p9 = scmp.eq.s32.totalorder %s388_s10, 0  ;;  %p416_p10 = pnand %p194_p7, %p67_p8 }
   0xe   : > { %s351_s19 = smov [#allocation2]  }
   0xf   : > { %s79_s20 = sshll.u32 %s351_s19, 4  ;;  %p211_p11 = pneg %p416_p10  ;;  %s80_s20 = int_to_ptr.vmem [resolvable:$true] %s79_s20 }
  0x10   : > { %s270_s21 = scalar_lea.vmem %s80_s20, 256  ;;  %p278_p3 = scmp.lt.s32.totalorder %s80_s20, %s80_s20 }
  0x11   : > { %p212_p12 = pnand %p219_p9, %p211_p11  ;;  %p271_p0 = scmp.ne.s32.totalorder %s80_s20, %s270_s21 }
  0x12   : > { %p279_p4 = scmp.lt.s32.totalorder %s270_s21, %s270_s21 }
  0x13   : > { %p261_p13 = pneg %p212_p12 }
  0x14   : > { %p280_p6 = por %p279_p4, %p278_p3 }
  0x15   : > { %p273_p1 = pnand %p271_p0, %p261_p13 }
  0x17   : > { %p274_p2 = pneg %p273_p1 }
  0x19   : > { %p281_p7 = pnand %p280_p6, %p274_p2 }
  0x1b   : > { %284 = shalt.err (!%p281_p7)
}
  0x1c   : > { %s352_s22 = smov 128   ;;  %s353_s23 = smov 8  }
  0x1d   : > { %214 = dma.hbm_to_vmem [thread:$0]  (!%p212_p12), %s482_s0, 256, %s80_s20, [#allocation3], %s352_s22, %s352_s22, %s353_s23  }
  0x1e   : > { %95 = sbr.rel (%p416_p10) target bundleno = 62 (0x3e), region = 24 }
  0x23   : > { %328 = dma.done.wait (%p219_p9), [#allocation3], 256  }
  0x24   : > { %330 = vsyncadd (%p219_p9), [#allocation3], 4294967040  ;;  %s107_s26 = sand.u32 1, %s341_s7   ;;  %s204_s28 = sshll.u32 %s388_s10, 8  ;;  %v111_v0 = vld [vmem:[#allocation2] sm:$0xff]  ;;  %v112_v1 = vld [vmem:[#allocation2 + $0x8] sm:$0xff] }
  0x25   : > { %s198_s27 = sshll.u32 %s107_s26, 4  ;;  %s438_s4 = scalar_lea.hbm %s483_s1, %s204_s28  ;;  %v113_v2 = vmul.f32 2.0, %v111_v0  ;;  %v114_v3 = vmul.f32 2.0, %v112_v1 }
  0x26   : > { %s109_s29 = scalar_lea.vmem [#allocation5], %s198_s27  ;;  %s442_s5 = scalar_lea.sflag [#allocation4], %s107_s26 }
  0x27   : > { %s131_s30 = sshll.u32 %s109_s29, 4  ;;  %115 = vst [vmem:[%s109_s29] sm:$0xff] %v113_v2  ;;  %116 = vst [vmem:[%s109_s29 + $0x8] sm:$0xff] %v114_v3  ;;  %s354_s11 = smov [#allocation5]   ;;  %s440_s30 = int_to_ptr.vmem [resolvable:$true] %s131_s30 }
  0x28   : > { %s285_s10 = scalar_lea.vmem %s440_s30, 256  ;;  %s289_s13 = sshll.u32 %s354_s11, 4  ;;  %s290_s13 = int_to_ptr.vmem [resolvable:$false] %s289_s13 }
  0x29   : > { %p286_p6 = scmp.ne.s32.totalorder %s440_s30, %s285_s10  ;;  %s291_s14 = scalar_lea.vmem %s290_s13, 512 }
  0x2a   : > { %p292_p10 = scmp.lt.s32.totalorder %s440_s30, %s290_s13  ;;  %p293_p11 = scmp.lt.s32.totalorder %s291_s14, %s285_s10 }
  0x2b   : > { %p287_p8 = pnand %p286_p6, %p405_p5 }
  0x2c   : > { %p294_p12 = por %p293_p11, %p292_p10 }
  0x2d   : > { %p288_p9 = pneg %p287_p8 }
  0x2f   : > { %p295_p13 = pnand %p294_p12, %p288_p9 }
  0x31   : > { %298 = shalt.err (!%p295_p13)
}
  0x32   : > { %s299_s18 = scalar_lea.hbm %s438_s4, 256  ;;  %s303_s21 = scalar_lea.hbm %s483_s1, 512 }
  0x33   : > { %p300_p0 = scmp.ne.s32.totalorder %s438_s4, %s299_s18  ;;  %p304_p3 = scmp.lt.s32.totalorder %s438_s4, %s483_s1 }
  0x34   : > { %p305_p4 = scmp.lt.s32.totalorder %s303_s21, %s299_s18 }
  0x35   : > { %p301_p1 = pnand %p300_p0, %p405_p5 }
  0x36   : > { %p306_p7 = por %p305_p4, %p304_p3 }
  0x37   : > { %p302_p2 = pneg %p301_p1 }
  0x39   : > { %p307_p6 = pnand %p306_p7, %p302_p2 }
  0x3b   : > { %310 = shalt.err (!%p307_p6)
}
  0x3c   : > { %s355_s24 = smov 128   ;;  %s356_s25 = smov 8  }
  0x3d   : > { %209 = dma.vmem_to_hbm [thread:$0]  (%p405_p5), %s440_s30, 256, %s438_s4, %s442_s5, %s355_s24, %s355_s24, %s356_s25  }
  0x3e PF: > { %p221_p8 = scmp.ge.s32.totalorder %s349_s9, 2  ;;  %s146_s26 = sand.u32 1, %s337_s6  }
  0x3f   : > { %p487_p9 = scmp.ne.s32.totalorder %s485_s17, 0  ;;  %s147_s27 = scalar_lea.sflag [#allocation4], %s146_s26 }
  0x41   : > { %p216_p10 = pnand %p221_p8, %p487_p9 }
  0x43   : > { %p217_p11 = pneg %p216_p10 }
  0x45   : > { %332 = dma.done.wait (%p217_p11), %s147_s27, 256  }
  0x46   : > { %334 = vsyncadd (%p217_p11), %s147_s27, 4294967040  ;;  %p12_p12 = scmp.ge.s32.totalorder %s392_s12, 4   ;;  %s488_s6 = smov %s341_s7 }
  0x47   : > { %s489_s7 = smov %s345_s8  ;;  %s490_s8 = smov %s403_s15 }
  0x48   : > { %s491_s9 = smov %s392_s12  ;;  %14 = sbr.rel (!%p12_p12) target bundleno = 4 (0x4), region = 61 }
  0x4d   :  { %152 = vsyncpa [#allocation3], 1 }
  0x4e   :  { %154 = vsyncpa [#allocation3 + $0x1], 1 }
  0x4f   :  { %155 = vsyncpa [#allocation4], 1 }
  0x50   :  { %157 = vsyncpa [#allocation4 + $0x1], 1 }

// kernel: tpu_custom_call.1
= control target key start
LH: loop header
LB: loop body
LE: loop exit
PB: predicated region body
PF: predicated region fallthrough
CT: control target
= control target key end

     0   :  { %12 = vsyncpa [#allocation5], 0  ;;  %s886_s0 = inlined_call_operand.hbm [shape: bf16[16,128], index: 0, kind: input, shape index: {}]   ;;  %s887_s1 = inlined_call_operand.hbm [shape: bf16[128,128], index: 1, kind: input, shape index: {}]   ;;  %s888_s2 = inlined_call_operand.vmem [shape: f32[1,128], index: 2, kind: input, shape index: {}]   ;;  %s889_s3 = inlined_call_operand.hbm [shape: bf16[128,128], index: 3, kind: input, shape index: {}]   ;;  %s890_s4 = inlined_call_operand.vmem [shape: f32[1,128], index: 4, kind: input, shape index: {}]   ;;  %s891_s5 = inlined_call_operand.hbm [shape: bf16[128,128], index: 5, kind: input, shape index: {}]   ;;  %s892_s6 = inlined_call_operand.vmem [shape: f32[1,128], index: 6, kind: input, shape index: {}]   ;;  %s893_s7 = inlined_call_operand.hbm [shape: f32[16,128], index: 7, kind: output, shape index: {}]  }
   0x1   :  { %13 = vsyncpa [#allocation8], 0 }
   0x2   :  { %14 = vsyncpa [#allocation11], 0 }
   0x3   :  { %15 = vsyncpa [#allocation6], 0  ;;  %s769_s24 = smov [#allocation7]   ;;  %s770_s26 = smov [#allocation4]  }
   0x4   :  { %s33_s25 = sshll.u32 %s769_s24, 4  ;;  %s21_s27 = sshll.u32 %s770_s26, 4  ;;  %s34_s25 = int_to_ptr.vmem [resolvable:$true] %s33_s25  ;;  %s22_s27 = int_to_ptr.vmem [resolvable:$true] %s21_s27 }
   0x5   :  { %s669_s28 = scalar_lea.vmem %s34_s25, 1024  ;;  %p674_p1 = scmp.lt.s32.totalorder %s34_s25, %s34_s25 }
   0x6   :  { %p670_p0 = scmp.ne.s32.totalorder %s34_s25, %s669_s28  ;;  %p675_p2 = scmp.lt.s32.totalorder %s669_s28, %s669_s28 }
   0x8   :  { %p676_p3 = por %p675_p2, %p674_p1 }
   0xa   :  { %p677_p4 = pnand %p676_p3, %p670_p0 }
   0xc   :  { %680 = shalt.err (!%p677_p4)
}
   0xd   :  { %s771_s29 = smov 64   ;;  %s772_s30 = smov 4  }
   0xe   :  { %39 = dma.hbm_to_vmem [thread:$0]  %s887_s1, 1024, %s34_s25, [#allocation8], %s771_s29, %s771_s29, %s772_s30  }
   0xf   :  { %s689_s10 = scalar_lea.vmem %s22_s27, 128  ;;  %p694_p6 = scmp.lt.s32.totalorder %s22_s27, %s22_s27 }
  0x10   :  { %p690_p5 = scmp.ne.s32.totalorder %s22_s27, %s689_s10  ;;  %p695_p7 = scmp.lt.s32.totalorder %s689_s10, %s689_s10 }
  0x12   :  { %p696_p8 = por %p695_p7, %p694_p6 }
  0x14   :  { %p697_p9 = pnand %p696_p8, %p690_p5 }
  0x16   :  { %700 = shalt.err (!%p697_p9)
}
  0x17   :  { %27 = dma.hbm_to_vmem [thread:$0]  %s886_s0, 128, %s22_s27, [#allocation5], %s771_s29, %s771_s29, %s772_s30  }
  0x18   :  { %s773_s13 = smov [#allocation9]   ;;  %s774_s15 = smov [#allocation10]  }
  0x19   :  { %s47_s14 = sshll.u32 %s773_s13, 4  ;;  %s61_s16 = sshll.u32 %s774_s15, 4  ;;  %s48_s14 = int_to_ptr.vmem [resolvable:$true] %s47_s14  ;;  %s62_s16 = int_to_ptr.vmem [resolvable:$true] %s61_s16 }
  0x1a   :  { %s709_s1 = scalar_lea.vmem %s48_s14, 1024  ;;  %p714_p11 = scmp.lt.s32.totalorder %s48_s14, %s48_s14 }
  0x1b   :  { %p710_p10 = scmp.ne.s32.totalorder %s48_s14, %s709_s1  ;;  %p715_p12 = scmp.lt.s32.totalorder %s709_s1, %s709_s1 }
  0x1d   :  { %p716_p13 = por %p715_p12, %p714_p11 }
  0x1f   :  { %p717_p0 = pnand %p716_p13, %p710_p10 }
  0x21   :  { %720 = shalt.err (!%p717_p0)
}
  0x22   :  { %53 = dma.hbm_to_vmem [thread:$0]  %s889_s3, 1024, %s48_s14, [#allocation8], %s771_s29, %s771_s29, %s772_s30  }
  0x23   :  { %s729_s0 = scalar_lea.vmem %s62_s16, 1024  ;;  %p734_p2 = scmp.lt.s32.totalorder %s62_s16, %s62_s16 }
  0x24   :  { %p730_p1 = scmp.ne.s32.totalorder %s62_s16, %s729_s0  ;;  %p735_p3 = scmp.lt.s32.totalorder %s729_s0, %s729_s0 }
  0x26   :  { %p736_p4 = por %p735_p3, %p734_p2 }
  0x28   :  { %p737_p5 = pnand %p736_p4, %p730_p1 }
  0x2a   :  { %740 = shalt.err (!%p737_p5)
}
  0x2b   :  { %67 = dma.hbm_to_vmem [thread:$0]  %s891_s5, 1024, %s62_s16, [#allocation11], %s771_s29, %s771_s29, %s772_s30  }
  0x2c   :  { %761 = dma.done.wait [#allocation5], 128  }
  0x2d   :  { %762 = vsyncadd [#allocation5], 4294967168 }
  0x2e   :  { %763 = dma.done.wait [#allocation8], 2048  }
  0x2f   :  { %764 = vsyncadd [#allocation8], 4294965248 }
  0x30   :  { %765 = dma.done.wait [#allocation11], 1024  }
  0x31   :  { %766 = vsyncadd [#allocation11], 4294966272  ;;  %v775_v0 = vmov 0.0   ;;  %vm776_vm0 = vmmov 0   ;;  %v634_v1 = vld [vmem:[#allocation7 + $0x38] sm:$0xff]   ;;  %v635_v2 = vld [vmem:[#allocation7 + $0x30] sm:$0xff]  }
  0x32   :  { %563 = vmatprep.subr.bf16.mxu0 %v775_v0  ;;  %579 = vmatprep.mubr.msk.bf16.mxu0 %vm776_vm0, %v775_v0  ;;  %v636_v3 = vld [vmem:[#allocation7 + $0x28] sm:$0xff]   ;;  %v643_v4 = vld [vmem:[#allocation9 + $0x38] sm:$0xff]   ;;  %v637_v5 = vld [vmem:[#allocation7 + $0x20] sm:$0xff]   ;;  %s777_s24 = smov [#allocation12]  }
  0x33   :  { %583 = vmatprep.subr.bf16.mxu1 %v775_v0  ;;  %599 = vmatprep.mubr.msk.bf16.mxu1 %vm776_vm0, %v775_v0  ;;  %v644_v6 = vld [vmem:[#allocation9 + $0x30] sm:$0xff]   ;;  %v638_v7 = vld [vmem:[#allocation7 + $0x18] sm:$0xff]   ;;  %v645_v8 = vld [vmem:[#allocation9 + $0x28] sm:$0xff]  }
  0x34   :  { %564 = vmatpush3.bf16.msra.mxu0 %v634_v1  ;;  %584 = vmatpush3.bf16.msra.mxu1 %v643_v4  ;;  %v639_v9 = vld [vmem:[#allocation7 + $0x10] sm:$0xff]   ;;  %v640_v10 = vld [vmem:[#allocation7 + $0x8] sm:$0xff]   ;;  %v641_v11 = vld [vmem:[#allocation7] sm:$0xff]  }
  0x35   :  { %565 = vmatprep.subr.bf16.mxu0 %v775_v0  ;;  %585 = vmatprep.subr.bf16.mxu1 %v775_v0  ;;  %v642_v12 = vld [vmem:[#allocation4] sm:$0xff]   ;;  %v646_v13 = vld [vmem:[#allocation9 + $0x20] sm:$0xff]   ;;  %v648_v15 = vld [vmem:[#allocation9 + $0x10] sm:$0xff]  }
  0x36   :  { %v647_v14 = vld [vmem:[#allocation9 + $0x18] sm:$0xff]   ;;  %v649_v16 = vld [vmem:[#allocation9 + $0x8] sm:$0xff]   ;;  %v650_v17 = vld [vmem:[#allocation9] sm:$0xff]  }
  0x37   :  { %v652_v18 = vld [vmem:[#allocation10 + $0x38] sm:$0xff]   ;;  %v653_v19 = vld [vmem:[#allocation10 + $0x30] sm:$0xff]   ;;  %v654_v20 = vld [vmem:[#allocation10 + $0x28] sm:$0xff]  }
  0x38   :  { %566 = vmatpush3.bf16.msra.mxu0 %v635_v2  ;;  %586 = vmatpush3.bf16.msra.mxu1 %v644_v6  ;;  %v488_v21 = vld [vmem:[%s888_s2] ss:$0 sm:$0xff]  ;;  %v655_v32 = vld [vmem:[#allocation10 + $0x20] sm:$0xff]   ;;  %v656_v33 = vld [vmem:[#allocation10 + $0x18] sm:$0xff]  }
  0x39   :  { %567 = vmatprep.subr.bf16.mxu0 %v775_v0  ;;  %587 = vmatprep.subr.bf16.mxu1 %v775_v0  ;;  %v657_v34 = vld [vmem:[#allocation10 + $0x10] sm:$0xff]   ;;  %v658_v35 = vld [vmem:[#allocation10 + $0x8] sm:$0xff]   ;;  %v659_v36 = vld [vmem:[#allocation10] sm:$0xff]  }
  0x3a   :  { %v500_v37 = vld [vmem:[%s890_s4] ss:$0 sm:$0xff]  ;;  %s474_s4 = sshll.u32 %s777_s24, 4  ;;  %s475_s4 = int_to_ptr.vmem [resolvable:$true] %s474_s4 }
  0x3b   :  { %v512_v48 = vld [vmem:[%s892_s6] ss:$0 sm:$0xff]  ;;  %s741_s25 = scalar_lea.vmem %s475_s4, 256  ;;  %p746_p7 = scmp.lt.s32.totalorder %s475_s4, %s475_s4 }
  0x3c   :  { %568 = vmatpush3.bf16.msra.mxu0 %v636_v3  ;;  %588 = vmatpush3.bf16.msra.mxu1 %v645_v8  ;;  %p742_p6 = scmp.ne.s32.totalorder %s475_s4, %s741_s25  ;;  %p747_p8 = scmp.lt.s32.totalorder %s741_s25, %s741_s25 }
  0x3d   :  { %569 = vmatprep.subr.bf16.mxu0 %v775_v0  ;;  %589 = vmatprep.subr.bf16.mxu1 %v775_v0 }
  0x3e   :  { %p748_p9 = por %p747_p8, %p746_p7 }
  0x40   :  { %570 = vmatpush3.bf16.msra.mxu0 %v637_v5  ;;  %590 = vmatpush3.bf16.msra.mxu1 %v646_v13  ;;  %p749_p10 = pnand %p748_p9, %p742_p6 }
  0x41   :  { %571 = vmatprep.subr.bf16.mxu0 %v775_v0  ;;  %591 = vmatprep.subr.bf16.mxu1 %v775_v0 }
  0x44   :  { %572 = vmatpush3.bf16.msra.mxu0 %v638_v7  ;;  %592 = vmatpush3.bf16.msra.mxu1 %v647_v14 }
  0x45   :  { %573 = vmatprep.subr.bf16.mxu0 %v775_v0  ;;  %593 = vmatprep.subr.bf16.mxu1 %v775_v0 }
  0x48   :  { %574 = vmatpush3.bf16.msra.mxu0 %v639_v9  ;;  %594 = vmatpush3.bf16.msra.mxu1 %v648_v15 }
  0x49   :  { %575 = vmatprep.subr.bf16.mxu0 %v775_v0  ;;  %595 = vmatprep.subr.bf16.mxu1 %v775_v0 }
  0x4c   :  { %576 = vmatpush3.bf16.msra.mxu0 %v640_v10  ;;  %596 = vmatpush3.bf16.msra.mxu1 %v649_v16 }
  0x4d   :  { %577 = vmatprep.subr.bf16.mxu0 %v775_v0  ;;  %597 = vmatprep.subr.bf16.mxu1 %v775_v0 }
  0x50   :  { %578 = vmatpush3.bf16.msra.mxu0 %v641_v11  ;;  %598 = vmatpush3.bf16.msra.mxu1 %v650_v17 }
  0x51   :  { %603 = vmatprep.subr.bf16.mxu0 %v775_v0 }
  0x53   :  { %580 = vmatmul.mubr.bf16.vlgmr.msra.gmra.mxu0 %v642_v12 }
  0x54   :  { %619 = vmatprep.mubr.msk.bf16.mxu0 %vm776_vm0, %v775_v0  ;;  %604 = vmatpush3.bf16.msra.mxu0 %v652_v18 }
  0x55   :  { %605 = vmatprep.subr.bf16.mxu0 %v775_v0 }
  0x58   :  { %606 = vmatpush3.bf16.msra.mxu0 %v653_v19 }
  0x59   :  { %607 = vmatprep.subr.bf16.mxu0 %v775_v0 }
  0x5c   :  { %608 = vmatpush3.bf16.msra.mxu0 %v654_v20 }
  0x5d   :  { %609 = vmatprep.subr.bf16.mxu0 %v775_v0 }
  0x60   :  { %610 = vmatpush3.bf16.msra.mxu0 %v655_v32 }
  0x61   :  { %611 = vmatprep.subr.bf16.mxu0 %v775_v0 }
  0x64   :  { %612 = vmatpush3.bf16.msra.mxu0 %v656_v33 }
  0x65   :  { %613 = vmatprep.subr.bf16.mxu0 %v775_v0 }
  0x68   :  { %614 = vmatpush3.bf16.msra.mxu0 %v657_v34 }
  0x69   :  { %615 = vmatprep.subr.bf16.mxu0 %v775_v0 }
  0x6c   :  { %616 = vmatpush3.bf16.msra.mxu0 %v658_v35 }
  0x6d   :  { %617 = vmatprep.subr.bf16.mxu0 %v775_v0 }
  0x70   :  { %618 = vmatpush3.bf16.msra.mxu0 %v659_v36 }
 0x113   :  { %v196_v22 = vpop.f32.mrf.mxu0 }
 0x114   :  { %v197_v24 = vadd.f32 %v488_v21, %v196_v22 }
 0x115   :  { %v581_v23 = vpop.f32.mrf.mxu0 }
 0x116   :  { %v203_v28 = vmax.f32 %v197_v24, 0.0 }
 0x117   :  { %v199_v25 = vpop.f32.mrf.mxu0 }
 0x118   :  { %v200_v26 = vadd.f32 %v488_v21, %v199_v25 }
 0x119   :  { %v582_v27 = vpop.f32.mrf.mxu0 }
 0x11a   :  { %v204_v29 = vmax.f32 %v200_v26, 0.0 }
 0x11c   :  { %v529_v30 = vpack.c.bf16 %v204_v29, %v203_v28 }
 0x11e   :  { %530 = vst [vmem:[#allocation2] sm:$0xff] %v529_v30  }
 0x125   :  { %v651_v31 = vld [vmem:[#allocation2] sm:$0xff]  }
 0x126   :  { %600 = vmatmul.mubr.bf16.vlgmr.msra.gmra.mxu1 %v651_v31 }
 0x1e6   :  { %v328_v38 = vpop.f32.mrf.mxu1 }
 0x1e7   :  { %v329_v40 = vadd.f32 %v500_v37, %v328_v38 }
 0x1e8   :  { %v601_v39 = vpop.f32.mrf.mxu1 }
 0x1e9   :  { %v335_v44 = vmax.f32 %v329_v40, 0.0 }
 0x1ea   :  { %v331_v41 = vpop.f32.mrf.mxu1 }
 0x1eb   :  { %v332_v42 = vadd.f32 %v500_v37, %v331_v41 }
 0x1ec   :  { %v602_v43 = vpop.f32.mrf.mxu1 }
 0x1ed   :  { %v336_v45 = vmax.f32 %v332_v42, 0.0 }
 0x1ef   :  { %v534_v46 = vpack.c.bf16 %v336_v45, %v335_v44 }
 0x1f1   :  { %535 = vst [vmem:[#allocation3] sm:$0xff] %v534_v46  }
 0x1f8   :  { %v660_v47 = vld [vmem:[#allocation3] sm:$0xff]  }
 0x1f9   :  { %620 = vmatmul.mubr.bf16.vlgmr.msra.gmra.mxu0 %v660_v47 }
 0x2b9   :  { %v460_v49 = vpop.f32.mrf.mxu0 }
 0x2ba   :  { %v461_v50 = vadd.f32 %v512_v48, %v460_v49 }
 0x2bb   :  { %v621_v51 = vpop.f32.mrf.mxu0 }
 0x2bc   :  { %467 = vst [vmem:[#allocation12] sm:$0xff] %v461_v50 }
 0x2bd   :  { %v463_v52 = vpop.f32.mrf.mxu0 }
 0x2be   :  { %v464_v53 = vadd.f32 %v512_v48, %v463_v52 }
 0x2bf   :  { %v622_v54 = vpop.f32.mrf.mxu0 }
 0x2c0   :  { %468 = vst [vmem:[#allocation12 + $0x8] sm:$0xff] %v464_v53 }
 0x2c1   :  { %752 = shalt.err (!%p749_p10)
}
 0x2c2   :  { %s778_s26 = smov 128   ;;  %s779_s6 = smov 8  }
 0x2c3   :  { %480 = dma.vmem_to_hbm [thread:$0]  %s475_s4, 256, %s893_s7, [#allocation6], %s778_s26, %s778_s26, %s779_s6  }
 0x2c4   :  { %767 = dma.done.wait [#allocation6], 256  }
 0x2c5   :  { %768 = vsyncadd [#allocation6], 4294967040 }
 0x2c6   :  { %484 = vsyncpa [#allocation5], 1 }
 0x2c7   :  { %485 = vsyncpa [#allocation8], 1 }
 0x2c8   :  { %486 = vsyncpa [#allocation11], 1 }
 0x2c9   :  { %487 = vsyncpa [#allocation6], 1 }

</bundles_post_ra>
